<compile_context>
chip_gen: v6e
topology: v6e:2x2x1
jax: 0.10.0
libtpu: 0.0.40
codegen_flags: <defaults>
</compile_context>

<pallas_src>
import math

import jax
import jax.numpy as jnp
from jax.experimental import pallas as pl
from jax.experimental.pallas import tpu as pltpu


def _round_up(x: int, m: int) -> int:
    return (x + m - 1) // m * m


def _make_arcface_kernel(cos_m: float, sin_m: float, s: float, tile_n: int):
    def kernel(emb_ref, w_ref, labels_ref, out_ref):
        # emb_ref   : (B_pad, D_pad)   embeddings with both inverse norms folded in
        # w_ref     : (D_pad, TILE_N)  raw weight tile (streamed over the N grid)
        # labels_ref: (B_pad, 1)       int32 labels
        cos_t = jnp.dot(emb_ref[...], w_ref[...],
                        preferred_element_type=jnp.float32)
        cos_t = jnp.clip(cos_t, -1.0, 1.0)
        # After the clip, 1 - cos^2 is in [0, 1]; sqrt already lands in [0, 1].
        sin_t = jnp.sqrt(jnp.maximum(1.0 - cos_t * cos_t, 0.0))
        cos_tm = jnp.where(cos_t > 0.0, cos_t * cos_m - sin_t * sin_m, cos_t)

        # One-hot mix as a single select against the global class index.
        col = jax.lax.broadcasted_iota(jnp.int32, cos_t.shape, 1)
        col = col + pl.program_id(0) * tile_n
        out = jnp.where(col == labels_ref[...], cos_tm, cos_t) * s
        out_ref[...] = out.astype(out_ref.dtype)

    return kernel


def arcface_layer(embeddings, weights, labels, *, m: float = 0.5, s: float = 64.0,
                  tile_n: int = 512, matmul_dtype=jnp.float32):
    """JAX wrapper reproducing ArcFaceLayer.forward(embeddings, labels)."""
    B, D = embeddings.shape
    D2, N = weights.shape
    assert D == D2

    emb = embeddings.astype(jnp.float32)
    w = weights.astype(jnp.float32)

    # F.normalize(x, dim=1): x / max(||x||, 1e-12) == x * rsqrt(max(sumsq, 1e-24))
    inv_emb = jax.lax.rsqrt(
        jnp.maximum(jnp.sum(emb * emb, axis=1, keepdims=True), 1e-24))   # (B, 1)
    inv_w = jax.lax.rsqrt(
        jnp.maximum(jnp.sum(w * w, axis=1), 1e-24))                      # (D,)
    # Fold both norms into the small (B, D) operand; the (D, N) weight stays raw:
    #   sum_d (emb[b,d]*inv_emb[b]*inv_w[d]) * W[d,n]  ==  emb_n @ W_n
    emb_scaled = emb * inv_emb * inv_w[None, :]

    # Padding: B -> x8 sublanes, D/N -> x128 lanes. Zero pads don't change results.
    b_pad = _round_up(B, 8)
    d_pad = _round_up(D, 128)
    tile_n = min(tile_n, _round_up(N, 128))
    n_pad = _round_up(N, tile_n)

    emb_p = jnp.zeros((b_pad, d_pad), matmul_dtype).at[:B, :D].set(
        emb_scaled.astype(matmul_dtype))
    w_p = jnp.zeros((d_pad, n_pad), matmul_dtype).at[:D, :N].set(
        w.astype(matmul_dtype))
    labels_p = jnp.full((b_pad, 1), -1, jnp.int32).at[:B, 0].set(
        labels.astype(jnp.int32))

    grid_n = n_pad // tile_n
    kernel = _make_arcface_kernel(math.cos(m), math.sin(m), float(s), tile_n)

    itemsize = jnp.dtype(matmul_dtype).itemsize
    resident = (b_pad * d_pad * itemsize + 4 * b_pad          # emb + labels (resident)
                + 2 * d_pad * tile_n * itemsize               # double-buffered W tile
                + 2 * b_pad * tile_n * 4)                     # double-buffered out tile
    vmem_limit = int(min(48 * 2**20, max(16 * 2**20, 2 * resident)))

    out = pl.pallas_call(
        kernel,
        out_shape=jax.ShapeDtypeStruct((b_pad, n_pad), jnp.float32),
        grid_spec=pltpu.PrefetchScalarGridSpec(
            num_scalar_prefetch=0,
            grid=(grid_n,),
            in_specs=[
                pl.BlockSpec((b_pad, d_pad), lambda j: (0, 0)),   # resident emb
                pl.BlockSpec((d_pad, tile_n), lambda j: (0, j)),  # streamed W tiles
                pl.BlockSpec((b_pad, 1), lambda j: (0, 0)),       # resident labels
            ],
            out_specs=pl.BlockSpec((b_pad, tile_n), lambda j: (0, j)),
        ),
        compiler_params=pltpu.CompilerParams(
            dimension_semantics=("parallel",),   # split N tiles across TCs (v7x)
            vmem_limit_bytes=vmem_limit,
        ),
    )(emb_p, w_p, labels_p)

    return out[:B, :N]


if __name__ == "__main__":
    # ArcFaceLayer defaults: m=0.5, s=64; small shapes for the synthetic run.
    B, D, N = 8, 64, 10
    m, s = 0.5, 64.0

    key = jax.random.PRNGKey(0)
    k_emb, k_w, k_lab = jax.random.split(key, 3)

    embeddings = jax.random.normal(k_emb, (B, D), dtype=jnp.float32)
    # Deterministic xavier_uniform_ init for the (in_features, out_features) weight.
    bound = math.sqrt(6.0 / (D + N))
    weights = jax.random.uniform(k_w, (D, N), jnp.float32, -bound, bound)
    labels = jax.random.randint(k_lab, (B,), 0, N, dtype=jnp.int32)

    out = arcface_layer(embeddings, weights, labels, m=m, s=s)
    out = jax.block_until_ready(out)

    # Pure-JAX reference replicating the PyTorch module exactly.
    emb_n = embeddings / jnp.maximum(
        jnp.linalg.norm(embeddings, axis=1, keepdims=True), 1e-12)
    w_n = weights / jnp.maximum(
        jnp.linalg.norm(weights, axis=1, keepdims=True), 1e-12)
    cos = jnp.clip(jnp.matmul(emb_n, w_n, precision=jax.lax.Precision.HIGHEST),
                   -1.0, 1.0)
    sin = jnp.clip(jnp.sqrt(jnp.maximum(1.0 - cos ** 2, 0.0)), 0.0, 1.0)
    cos_mm = jnp.where(cos > 0, cos * math.cos(m) - sin * math.sin(m), cos)
    one_hot = jax.nn.one_hot(labels, N, dtype=jnp.float32)
    ref = (one_hot * cos_mm + (1.0 - one_hot) * cos) * s

    assert out.shape == (B, N) and out.dtype == jnp.float32
    assert jnp.allclose(out, ref, atol=1e-4, rtol=1e-4), \
        float(jnp.max(jnp.abs(out - ref)))
    print("KERNEL_OK")
</pallas_src>

<mosaic_0001>
module attributes {stable_mosaic.version = 11 : i64} {
  func.func @kernel(%arg0: i32, %arg1: memref<8x128xf32, #tpu.memory_space<vmem>>, %arg2: memref<128x128xf32, #tpu.memory_space<vmem>>, %arg3: memref<8x1xi32, #tpu.memory_space<vmem>>, %arg4: memref<8x128xf32, #tpu.memory_space<vmem>>) attributes {dimension_semantics = [#tpu.dimension_semantics<parallel>], iteration_bounds = array<i64: 1>, scalar_prefetch = 0 : i64, scratch_operands = 0 : i64, tpu.core_type = #tpu.core_type<tc>, window_params = [{pipeline_mode = #tpu.pipeline_mode<synchronous>, transform_indices = @transform_0, window_bounds = array<i64: 8, 128>}, {transform_indices = @transform_1, window_bounds = array<i64: 128, 128>}, {pipeline_mode = #tpu.pipeline_mode<synchronous>, transform_indices = @transform_2, window_bounds = array<i64: 8, 1>}, {transform_indices = @transform_3, window_bounds = array<i64: 8, 128>}]} {
    %c0 = arith.constant 0 : index
    %c0_0 = arith.constant 0 : index
    %0 = vector.load %arg1[%c0, %c0_0] : memref<8x128xf32, #tpu.memory_space<vmem>>, vector<8x128xf32>
    %c0_1 = arith.constant 0 : index
    %c0_2 = arith.constant 0 : index
    %1 = vector.load %arg2[%c0_1, %c0_2] : memref<128x128xf32, #tpu.memory_space<vmem>>, vector<128x128xf32>
    %cst = arith.constant dense<0.000000e+00> : vector<8x128xf32>
    %2 = tpu.matmul %0, %1, %cst {dimension_numbers = #tpu.dot_dimension_numbers<[1], [0], [0], [1], [0, 0, 1, 1], [], []>} : vector<8x128xf32>, vector<128x128xf32>, vector<8x128xf32> -> vector<8x128xf32>
    %cst_3 = arith.constant -1.000000e+00 : f32
    %cst_4 = arith.constant 1.000000e+00 : f32
    %3 = vector.broadcast %cst_3 : f32 to vector<8x128xf32>
    %4 = arith.maximumf %3, %2 : vector<8x128xf32>
    %5 = vector.broadcast %cst_4 : f32 to vector<8x128xf32>
    %6 = arith.minimumf %5, %4 : vector<8x128xf32>
    %7 = arith.mulf %6, %6 : vector<8x128xf32>
    %cst_5 = arith.constant 1.000000e+00 : f32
    %8 = vector.broadcast %cst_5 : f32 to vector<8x128xf32>
    %9 = arith.subf %8, %7 : vector<8x128xf32>
    %cst_6 = arith.constant 0.000000e+00 : f32
    %10 = vector.broadcast %cst_6 : f32 to vector<8x128xf32>
    %11 = arith.maximumf %9, %10 : vector<8x128xf32>
    %12 = math.sqrt %11 : vector<8x128xf32>
    %cst_7 = arith.constant 0.000000e+00 : f32
    %13 = vector.broadcast %cst_7 : f32 to vector<8x128xf32>
    %14 = arith.cmpf ogt, %6, %13 : vector<8x128xf32>
    %cst_8 = arith.constant 0.87758255 : f32
    %15 = vector.broadcast %cst_8 : f32 to vector<8x128xf32>
    %16 = arith.mulf %6, %15 : vector<8x128xf32>
    %cst_9 = arith.constant 0.47942555 : f32
    %17 = vector.broadcast %cst_9 : f32 to vector<8x128xf32>
    %18 = arith.mulf %12, %17 : vector<8x128xf32>
    %19 = arith.subf %16, %18 : vector<8x128xf32>
    %20 = arith.select %14, %19, %6 : vector<8x128xi1>, vector<8x128xf32>
    %21 = tpu.iota {dimensions = array<i32: 1>} : vector<8x128xi32>
    %c128_i32 = arith.constant 128 : i32
    %22 = arith.muli %arg0, %c128_i32 : i32
    %23 = vector.broadcast %22 : i32 to vector<8x128xi32>
    %24 = arith.addi %21, %23 : vector<8x128xi32>
    %c0_10 = arith.constant 0 : index
    %c0_11 = arith.constant 0 : index
    %25 = vector.load %arg3[%c0_10, %c0_11] : memref<8x1xi32, #tpu.memory_space<vmem>>, vector<8x1xi32>
    %26 = vector.broadcast %25 : vector<8x1xi32> to vector<8x128xi32>
    %27 = arith.cmpi eq, %24, %26 : vector<8x128xi32>
    %28 = arith.select %27, %20, %6 : vector<8x128xi1>, vector<8x128xf32>
    %cst_12 = arith.constant 6.400000e+01 : f32
    %29 = vector.broadcast %cst_12 : f32 to vector<8x128xf32>
    %30 = arith.mulf %28, %29 : vector<8x128xf32>
    %c0_13 = arith.constant 0 : index
    %c0_14 = arith.constant 0 : index
    %31 = vector.load %arg4[%c0_13, %c0_14] : memref<8x128xf32, #tpu.memory_space<vmem>>, vector<8x128xf32>
    tpu.vector_store %arg4[%c0_13, %c0_14], %30 {strides = array<i32>} : memref<8x128xf32, #tpu.memory_space<vmem>>, vector<8x128xf32>,
    return
  }
  func.func @transform_0(%arg0: i32) -> (i32, i32) {
    %c0_i32 = arith.constant 0 : i32
    %c0_i32_0 = arith.constant 0 : i32
    %c0_i32_1 = arith.constant 0 : i32
    return %c0_i32, %c0_i32_0 : i32, i32
  }
  func.func @transform_1(%arg0: i32) -> (i32, i32) {
    %c0_i32 = arith.constant 0 : i32
    %c0_i32_0 = arith.constant 0 : i32
    return %c0_i32, %arg0 : i32, i32
  }
  func.func @transform_2(%arg0: i32) -> (i32, i32) {
    %c0_i32 = arith.constant 0 : i32
    %c0_i32_0 = arith.constant 0 : i32
    %c0_i32_1 = arith.constant 0 : i32
    return %c0_i32, %c0_i32_0 : i32, i32
  }
  func.func @transform_3(%arg0: i32) -> (i32, i32) {
    %c0_i32 = arith.constant 0 : i32
    %c0_i32_0 = arith.constant 0 : i32
    return %c0_i32, %arg0 : i32, i32
  }
}

</mosaic_0001>

<bundles_post_ra>
// kernel: tpu_custom_call.1
= control target key start
LH: loop header
LB: loop body
LE: loop exit
PB: predicated region body
PF: predicated region fallthrough
CT: control target
= control target key end

     0   :  { %8 = vsyncpa [#allocation3], 0  ;;  %s307_s0 = inlined_call_operand.vmem [shape: f32[8,128], index: 0, kind: input, shape index: {}]   ;;  %s308_s1 = inlined_call_operand.hbm [shape: f32[128,128], index: 1, kind: input, shape index: {}]   ;;  %s309_s2 = inlined_call_operand.vmem [shape: s32[8,1], index: 2, kind: input, shape index: {}]   ;;  %s310_s3 = inlined_call_operand.hbm [shape: f32[8,128], index: 3, kind: output, shape index: {}]  }
   0x1   :  { %9 = vsyncpa [#allocation4], 0  ;;  %s268_s12 = smov [#allocation2]  }
   0x2   :  { %s17_s13 = sshll.u32 %s268_s12, 4  ;;  %s18_s13 = int_to_ptr.vmem [resolvable:$true] %s17_s13 }
   0x3   :  { %s232_s14 = scalar_lea.vmem %s18_s13, 2048  ;;  %p237_p1 = scmp.lt.s32.totalorder %s18_s13, %s18_s13 }
   0x4   :  { %p233_p0 = scmp.ne.s32.totalorder %s18_s13, %s232_s14  ;;  %p238_p2 = scmp.lt.s32.totalorder %s232_s14, %s232_s14 }
   0x6   :  { %p239_p3 = por %p238_p2, %p237_p1 }
   0x8   :  { %p240_p4 = pnand %p239_p3, %p233_p0 }
   0xa   :  { %243 = shalt.err (!%p240_p4)
}
   0xb   :  { %s269_s15 = smov 128   ;;  %s270_s16 = smov 8  }
   0xc   :  { %23 = dma.hbm_to_vmem [thread:$0]  %s308_s1, 2048, %s18_s13, [#allocation3], %s269_s15, %s269_s15, %s270_s16  }
   0xd   :  { %264 = dma.done.wait [#allocation3], 2048  }
   0xe   :  { %265 = vsyncadd [#allocation3], 4294965248  ;;  %v271_v0 = vmov 0.0   ;;  %vm272_vm0 = vmmov 0   ;;  %v273_v1 = vmov 0   ;;  %v45_v2 = vld [vmem:[#allocation2 + $0x78] sm:$0xff]  ;;  %v133_v26 = vlaneseq }
   0xf   :  { %179 = vmatprep.subr.mxu0 %v271_v0  ;;  %211 = vmatprep.mubr.msk.f32.mxu0 %vm272_vm0, %v271_v0  ;;  %v44_v3 = vld [vmem:[#allocation2 + $0x70] sm:$0xff]  ;;  %v43_v4 = vld [vmem:[#allocation2 + $0x68] sm:$0xff]  ;;  %v42_v5 = vld [vmem:[#allocation2 + $0x60] sm:$0xff] }
  0x10   :  { %221 = vset.pattern.permute.xlu0 %v273_v1  ;;  %180 = vmatpush3.msra.mxu0 %v45_v2  ;;  %v138_v6 = vld [vmem:[%s309_s2] sm:$0xff]  ;;  %v41_v7 = vld [vmem:[#allocation2 + $0x58] sm:$0xff]  ;;  %v40_v8 = vld [vmem:[#allocation2 + $0x50] sm:$0xff]  ;;  %v134_v30 = vand.u32 127, %v133_v26 }
  0x11   :  { %181 = vmatprep.subr.mxu0 %v271_v0  ;;  %140 = vperm.xlu0 %221, %v138_v6   ;;  %v39_v9 = vld [vmem:[#allocation2 + $0x48] sm:$0xff]  ;;  %v38_v10 = vld [vmem:[#allocation2 + $0x40] sm:$0xff]  ;;  %v37_v11 = vld [vmem:[#allocation2 + $0x38] sm:$0xff] }
  0x12   :  { %182 = vmatpush3.msra.mxu0 %v44_v3  ;;  %v36_v12 = vld [vmem:[#allocation2 + $0x30] sm:$0xff]  ;;  %v35_v13 = vld [vmem:[#allocation2 + $0x28] sm:$0xff]  ;;  %v34_v14 = vld [vmem:[#allocation2 + $0x20] sm:$0xff] }
  0x13   :  { %183 = vmatprep.subr.mxu0 %v271_v0  ;;  %v33_v15 = vld [vmem:[#allocation2 + $0x18] sm:$0xff]  ;;  %v32_v16 = vld [vmem:[#allocation2 + $0x10] sm:$0xff]  ;;  %v31_v17 = vld [vmem:[#allocation2 + $0x8] sm:$0xff] }
  0x14   :  { %184 = vmatpush3.msra.mxu0 %v43_v4  ;;  %v30_v18 = vld [vmem:[#allocation2] sm:$0xff] }
  0x15   :  { %185 = vmatprep.subr.mxu0 %v271_v0  ;;  %v29_v19 = vld [vmem:[%s307_s0] sm:$0xff]  ;;  %s274_s0 = smov [#allocation5]  }
  0x16   :  { %186 = vmatpush3.msra.mxu0 %v42_v5  ;;  %s152_s21 = sshll.u32 %s274_s0, 4  ;;  %s153_s21 = int_to_ptr.vmem [resolvable:$true] %s152_s21 }
  0x17   :  { %187 = vmatprep.subr.mxu0 %v271_v0  ;;  %s244_s22 = scalar_lea.vmem %s153_s21, 128  ;;  %p249_p6 = scmp.lt.s32.totalorder %s153_s21, %s153_s21 }
  0x18   :  { %188 = vmatpush3.msra.mxu0 %v41_v7  ;;  %p245_p5 = scmp.ne.s32.totalorder %s153_s21, %s244_s22  ;;  %p250_p7 = scmp.lt.s32.totalorder %s244_s22, %s244_s22 }
  0x19   :  { %189 = vmatprep.subr.mxu0 %v271_v0 }
  0x1a   :  { %190 = vmatpush3.msra.mxu0 %v40_v8  ;;  %p251_p8 = por %p250_p7, %p249_p6 }
  0x1b   :  { %191 = vmatprep.subr.mxu0 %v271_v0 }
  0x1c   :  { %192 = vmatpush3.msra.mxu0 %v39_v9  ;;  %p252_p9 = pnand %p251_p8, %p245_p5 }
  0x1d   :  { %193 = vmatprep.subr.mxu0 %v271_v0 }
  0x1e   :  { %194 = vmatpush3.msra.mxu0 %v38_v10 }
  0x1f   :  { %195 = vmatprep.subr.mxu0 %v271_v0 }
  0x20   :  { %196 = vmatpush3.msra.mxu0 %v37_v11 }
  0x21   :  { %197 = vmatprep.subr.mxu0 %v271_v0 }
  0x22   :  { %198 = vmatpush3.msra.mxu0 %v36_v12 }
  0x23   :  { %199 = vmatprep.subr.mxu0 %v271_v0 }
  0x24   :  { %200 = vmatpush3.msra.mxu0 %v35_v13 }
  0x25   :  { %201 = vmatprep.subr.mxu0 %v271_v0 }
  0x26   :  { %202 = vmatpush3.msra.mxu0 %v34_v14 }
  0x27   :  { %203 = vmatprep.subr.mxu0 %v271_v0 }
  0x28   :  { %204 = vmatpush3.msra.mxu0 %v33_v15 }
  0x29   :  { %205 = vmatprep.subr.mxu0 %v271_v0 }
  0x2a   :  { %206 = vmatpush3.msra.mxu0 %v32_v16 }
  0x2b   :  { %207 = vmatprep.subr.mxu0 %v271_v0 }
  0x2c   :  { %208 = vmatpush3.msra.mxu0 %v31_v17 }
  0x2d   :  { %209 = vmatprep.subr.mxu0 %v271_v0 }
  0x2e   :  { %210 = vmatpush3.msra.mxu0 %v30_v18 }
  0x2f   :  { %212 = vmatmul.mubr.f32.vlgmr.msra.gmra.mxu0 %v29_v19 }
  0x8c   :  { %v141_v32 = vpop.permute.xlu0 %140 }
  0x8d   :  { %vm142_vm3 = vcmp.eq.s32.totalorder %v134_v30, %v141_v32 }
  0xef   :  { %v112_v20 = vpop.f32.mrf.mxu0 }
  0xf0   :  { %v161_v21 = vclamps-f32 %v112_v20, 1.0 }
  0xf1   :  { %v213_v22 = vpop.f32.mrf.mxu0 }
  0xf2   :  { %v118_v23 = vmul.f32 %v161_v21, %v161_v21  ;;  %v129_v34 = vmul.f32 0.87758255, %v161_v21  ;;  %vm128_vm4 = vcmp.gt.f32.partialorder %v161_v21, 0.0 }
  0xf4   :  { %v119_v24 = vsub.f32 1.0, %v118_v23 }
  0xf6   :  { %v120_v25 = vmax.f32 %v119_v24, 0.0 }
  0xf8   :  { %222 = vrsqrt.f32 %v120_v25  ;;  %vm123_vm1 = vcmp.eq.f32.partialorder %v120_v25, inf  ;;  %v126_v29 = vand.u32 2147483648, %v120_v25  ;;  %vm125_vm2 = vcmp.eq.f32.partialorder %v120_v25, 0.0 }
 0x105   :  { %v223_v27 = vpop.eup %222 }
 0x106   :  { %v122_v28 = vmul.f32 %v223_v27, %v120_v25 }
 0x108   :  { %v124_v31 = vsel %vm123_vm1, %v120_v25, %v122_v28 }
 0x109   :  { %v127_v33 = vsel %vm125_vm2, %v126_v29, %v124_v31 }
 0x10a   :  { %v130_v35 = vmul.f32 0.47942555, %v127_v33 }
 0x10c   :  { %v131_v36 = vsub.f32 %v129_v34, %v130_v35 }
 0x10e   :  { %v132_v37 = vsel %vm128_vm4, %v131_v36, %v161_v21 }
 0x10f   :  { %v143_v38 = vsel %vm142_vm3, %v132_v37, %v161_v21 }
 0x110   :  { %v144_v39 = vmul.f32 64.0, %v143_v38 }
 0x112   :  { %145 = vst [vmem:[#allocation5] sm:$0xff] %v144_v39 }
 0x113   :  { %255 = shalt.err (!%p252_p9)
}
 0x114   :  { %155 = dma.vmem_to_hbm [thread:$0]  %s153_s21, 128, %s310_s3, [#allocation4]  }
 0x115   :  { %266 = dma.done.wait [#allocation4], 128  }
 0x116   :  { %267 = vsyncadd [#allocation4], 4294967168 }
 0x117   :  { %159 = vsyncpa [#allocation3], 1 }
 0x118   :  { %160 = vsyncpa [#allocation4], 1 }

</bundles_post_ra>
